<compile_context>
chip_gen: v7x
topology: tpu7x:2x2x1
jax: 0.10.0
libtpu: 0.0.40
codegen_flags: <defaults>
</compile_context>

<pallas_src>
import functools

import jax
import jax.numpy as jnp
from jax.experimental import pallas as pl
from jax.experimental.pallas import tpu as pltpu


def _round_up(n, m):
    return ((n + m - 1) // m) * m


def _pick_tb(b):
    """Largest divisor of b (<= 8) that still leaves >= 2 grid steps."""
    divisors = [d for d in range(min(b, 8), 0, -1) if b % d == 0]
    for d in divisors:
        if b // d >= 2:
            return d
    return divisors[0]


def _perceptual_l1_kernel(x_ref, w_ref, b_ref, o_ref, col_ref, *,
                          tap_starts, cin, p_valid, pp, wp, w_img, inv_n, tb):
    """One grid step == tb batch samples (real & recon streams fused).

    x_ref:   (tb*2*cin, L)       bf16  zero-padded images, flat spatial on lanes
    w_ref:   (Cout, K*K*cin)     bf16  weight; column index = (dy*K+dx)*cin + c
    b_ref:   (Cout, 1)           f32   conv bias
    o_ref:   (tb, 128)           f32   per-sample weighted loss (lane-broadcast)
    col_ref: (K*K*cin, 2*tb*pp)  bf16  im2col scratch, cols = (g, spatial)
    """
    g_total = 2 * tb

    # ---- on-chip im2col: each lane-shifted tap slab is written exactly once.
    for g in range(g_total):
        for t, s in enumerate(tap_starts):
            col_ref[t * cin:(t + 1) * cin, g * pp:(g + 1) * pp] = \
                x_ref[g * cin:(g + 1) * cin, s:s + pp]

    # ---- single fused MXU matmul (shared weight), f32 accumulate.
    feat = jnp.dot(w_ref[...], col_ref[...],
                   preferred_element_type=jnp.float32)       # (Cout, g_total*pp)
    feat = jnp.maximum(feat + b_ref[...], 0.0)               # frozen features

    # ---- valid-column mask built in-kernel (no extra HBM stream).
    col = jax.lax.broadcasted_iota(jnp.int32, (1, pp), 1)
    mask = jnp.logical_and(col < p_valid, col % wp < w_img).astype(jnp.float32)

    # ---- l1_loss(reduction='none'), mask wrap/pad columns, per-sample mean,
    #      loss weighting.  (2*i)*pp slices are 128-aligned (pp % 128 == 0).
    for i in range(tb):
        f_real = feat[:, (2 * i) * pp:(2 * i + 1) * pp]
        f_recon = feat[:, (2 * i + 1) * pp:(2 * i + 2) * pp]
        l1 = jnp.abs(f_recon - f_real) * mask
        s = jnp.sum(jnp.sum(l1, axis=1, keepdims=True), axis=0, keepdims=True)
        o_ref[i:i + 1, :] = jnp.broadcast_to(s * inv_n, (1, 128))


@functools.partial(jax.jit, static_argnames=("weight",))
def perceptual_loss(batch_img, model_output, conv_w, conv_b, *, weight=0.1):
    """Returns per-sample weighted perceptual L1 loss, shape (B,)."""
    B, C, H, W = batch_img.shape
    Cout, Cin, K, _ = conv_w.shape
    assert Cin == C
    pad = K // 2
    Hp, Wp = H + 2 * pad, W + 2 * pad
    P = H * Wp                              # flattened output positions / channel
    Pp = _round_up(P, 128)                  # lane-aligned per-sample column block
    s_max = (K - 1) * Wp + (K - 1)          # largest tap offset
    extra_rows = -(-max(0, s_max + Pp - Hp * Wp) // Wp)     # ceil-div
    L = (Hp + extra_rows) * Wp              # per-channel flattened length

    TB = _pick_tb(B)                        # samples per grid step (>=2 steps)
    grid = (B // TB,)
    rows = TB * 2 * C

    # --- host prelude: bf16 cast early + ONE pad (SAME + zero tail rows),
    #     then free reshapes.  Fused by XLA under jit.
    x = jnp.stack([batch_img, model_output], axis=1).astype(jnp.bfloat16)
    x = jnp.pad(x, ((0, 0), (0, 0), (0, 0),
                    (pad, pad + extra_rows), (pad, pad)))
    x = x.reshape(B // TB, rows, L)                          # (grid, TB*2*C, L)

    # Shared weight matrix: column index = (dy*K+dx)*C + c  (matches im2col rows).
    w_mat = conv_w.transpose(0, 2, 3, 1).reshape(Cout, K * K * C)
    w_mat = w_mat.astype(jnp.bfloat16)
    b_col = conv_b.reshape(Cout, 1).astype(jnp.float32)

    tap_starts = tuple(dy * Wp + dx for dy in range(K) for dx in range(K))

    out = pl.pallas_call(
        functools.partial(
            _perceptual_l1_kernel,
            tap_starts=tap_starts, cin=C, p_valid=P, pp=Pp, wp=Wp, w_img=W,
            inv_n=float(weight) / float(Cout * H * W), tb=TB),
        out_shape=jax.ShapeDtypeStruct((B // TB, TB, 128), jnp.float32),
        grid_spec=pltpu.PrefetchScalarGridSpec(
            num_scalar_prefetch=0,
            grid=grid,
            in_specs=[
                pl.BlockSpec((None, rows, L), lambda b: (b, 0, 0)),
                pl.BlockSpec((Cout, K * K * C), lambda b: (0, 0)),
                pl.BlockSpec((Cout, 1), lambda b: (0, 0)),
            ],
            out_specs=pl.BlockSpec((None, TB, 128), lambda b: (b, 0, 0)),
            scratch_shapes=[pltpu.VMEM((K * K * C, 2 * TB * Pp), jnp.bfloat16)],
        ),
        compiler_params=pltpu.CompilerParams(
            dimension_semantics=("parallel",)),
    )(x, w_mat, b_col)

    # TODO(synk): for large H*W add a spatial-reduction grid axis (f32 VMEM
    # accumulator + pl.when init/finalize), with tiles budgeted for v7x's
    # 64 MiB VMEM (explicit vmem_limit_bytes, lane tiles >= 512).
    return out.reshape(B, 128)[:, 0]


def _reference(batch_img, model_output, conv_w, conv_b, *, weight=0.1):
    """Pure-JAX (f32) reference mirroring the PyTorch forward."""
    def feats(z):
        y = jax.lax.conv_general_dilated(
            z, conv_w, window_strides=(1, 1), padding="SAME",
            dimension_numbers=("NCHW", "OIHW", "NCHW"))
        y = y + conv_b.reshape(1, -1, 1, 1)
        return jnp.maximum(y, 0.0)

    fr = feats(batch_img)
    fc = feats(model_output)
    l1 = jnp.abs(fc - fr)
    return l1.reshape(l1.shape[0], -1).mean(axis=1) * weight


if __name__ == "__main__":
    B, C, H, W = 2, 4, 16, 16
    Cout, K = 8, 3

    key = jax.random.PRNGKey(0)
    k1, k2, k3, k4 = jax.random.split(key, 4)

    batch_img = jax.random.normal(k1, (B, C, H, W), jnp.float32)     # batch[batch_key]
    model_output = jax.random.normal(k2, (B, C, H, W), jnp.float32)  # model_output
    conv_w = 0.1 * jax.random.normal(k3, (Cout, C, K, K), jnp.float32)
    conv_b = 0.01 * jax.random.normal(k4, (Cout,), jnp.float32)

    losses = perceptual_loss(batch_img, model_output, conv_w, conv_b, weight=0.1)
    losses = jax.block_until_ready(losses)

    ref = _reference(batch_img, model_output, conv_w, conv_b, weight=0.1)
    assert losses.shape == (B,)
    # bf16 streaming operands (f32 accumulate) vs f32 reference -> relaxed tol.
    assert jnp.allclose(losses, ref, rtol=3e-2, atol=2e-3), (losses, ref)

    # LossOutput(metrics={}, losses={'perceptual': losses}) equivalent.
    print("KERNEL_OK")
</pallas_src>

<mosaic_0001>
module attributes {stable_mosaic.version = 11 : i64} {
  func.func @_perceptual_l1_kernel(%arg0: i32, %arg1: memref<1x8x432xbf16, #tpu.memory_space<vmem>>, %arg2: memref<8x36xbf16, #tpu.memory_space<vmem>>, %arg3: memref<8x1xf32, #tpu.memory_space<vmem>>, %arg4: memref<1x1x128xf32, #tpu.memory_space<vmem>>, %arg5: memref<36x768xbf16, #tpu.memory_space<vmem>>) attributes {dimension_semantics = [#tpu.dimension_semantics<parallel>], iteration_bounds = array<i64: 2>, scalar_prefetch = 0 : i64, scratch_operands = 1 : i64, tpu.core_type = #tpu.core_type<tc>, window_params = [{transform_indices = @transform_0, window_bounds = array<i64: 1, 8, 432>}, {pipeline_mode = #tpu.pipeline_mode<synchronous>, transform_indices = @transform_1, window_bounds = array<i64: 8, 36>}, {pipeline_mode = #tpu.pipeline_mode<synchronous>, transform_indices = @transform_2, window_bounds = array<i64: 8, 1>}, {transform_indices = @transform_3, window_bounds = array<i64: 1, 1, 128>}]} {
    %c0 = arith.constant 0 : index
    %c0_0 = arith.constant 0 : index
    %c0_1 = arith.constant 0 : index
    %0 = vector.load %arg1[%c0, %c0_0, %c0_1] : memref<1x8x432xbf16, #tpu.memory_space<vmem>>, vector<1x4x384xbf16>
    %1 = vector.shape_cast %0 : vector<1x4x384xbf16> to vector<4x384xbf16>
    %c0_2 = arith.constant 0 : index
    %c0_3 = arith.constant 0 : index
    %2 = vector.load %arg5[%c0_2, %c0_3] : memref<36x768xbf16, #tpu.memory_space<vmem>>, vector<4x384xbf16>
    tpu.vector_store %arg5[%c0_2, %c0_3], %1 {strides = array<i32>} : memref<36x768xbf16, #tpu.memory_space<vmem>>, vector<4x384xbf16>,
    %c0_4 = arith.constant 0 : index
    %c0_5 = arith.constant 0 : index
    %c1 = arith.constant 1 : index
    %3 = vector.load %arg1[%c0_4, %c0_5, %c1] : memref<1x8x432xbf16, #tpu.memory_space<vmem>>, vector<1x4x384xbf16>
    %4 = vector.shape_cast %3 : vector<1x4x384xbf16> to vector<4x384xbf16>
    %c4 = arith.constant 4 : index
    %c0_6 = arith.constant 0 : index
    %5 = vector.load %arg5[%c4, %c0_6] : memref<36x768xbf16, #tpu.memory_space<vmem>>, vector<4x384xbf16>
    tpu.vector_store %arg5[%c4, %c0_6], %4 {strides = array<i32>} : memref<36x768xbf16, #tpu.memory_space<vmem>>, vector<4x384xbf16>,
    %c0_7 = arith.constant 0 : index
    %c0_8 = arith.constant 0 : index
    %c2 = arith.constant 2 : index
    %6 = vector.load %arg1[%c0_7, %c0_8, %c2] : memref<1x8x432xbf16, #tpu.memory_space<vmem>>, vector<1x4x384xbf16>
    %7 = vector.shape_cast %6 : vector<1x4x384xbf16> to vector<4x384xbf16>
    %c8 = arith.constant 8 : index
    %c0_9 = arith.constant 0 : index
    %8 = vector.load %arg5[%c8, %c0_9] : memref<36x768xbf16, #tpu.memory_space<vmem>>, vector<4x384xbf16>
    tpu.vector_store %arg5[%c8, %c0_9], %7 {strides = array<i32>} : memref<36x768xbf16, #tpu.memory_space<vmem>>, vector<4x384xbf16>,
    %c0_10 = arith.constant 0 : index
    %c0_11 = arith.constant 0 : index
    %c18 = arith.constant 18 : index
    %9 = vector.load %arg1[%c0_10, %c0_11, %c18] : memref<1x8x432xbf16, #tpu.memory_space<vmem>>, vector<1x4x384xbf16>
    %10 = vector.shape_cast %9 : vector<1x4x384xbf16> to vector<4x384xbf16>
    %c12 = arith.constant 12 : index
    %c0_12 = arith.constant 0 : index
    %11 = vector.load %arg5[%c12, %c0_12] : memref<36x768xbf16, #tpu.memory_space<vmem>>, vector<4x384xbf16>
    tpu.vector_store %arg5[%c12, %c0_12], %10 {strides = array<i32>} : memref<36x768xbf16, #tpu.memory_space<vmem>>, vector<4x384xbf16>,
    %c0_13 = arith.constant 0 : index
    %c0_14 = arith.constant 0 : index
    %c19 = arith.constant 19 : index
    %12 = vector.load %arg1[%c0_13, %c0_14, %c19] : memref<1x8x432xbf16, #tpu.memory_space<vmem>>, vector<1x4x384xbf16>
    %13 = vector.shape_cast %12 : vector<1x4x384xbf16> to vector<4x384xbf16>
    %c16 = arith.constant 16 : index
    %c0_15 = arith.constant 0 : index
    %14 = vector.load %arg5[%c16, %c0_15] : memref<36x768xbf16, #tpu.memory_space<vmem>>, vector<4x384xbf16>
    tpu.vector_store %arg5[%c16, %c0_15], %13 {strides = array<i32>} : memref<36x768xbf16, #tpu.memory_space<vmem>>, vector<4x384xbf16>,
    %c0_16 = arith.constant 0 : index
    %c0_17 = arith.constant 0 : index
    %c20 = arith.constant 20 : index
    %15 = vector.load %arg1[%c0_16, %c0_17, %c20] : memref<1x8x432xbf16, #tpu.memory_space<vmem>>, vector<1x4x384xbf16>
    %16 = vector.shape_cast %15 : vector<1x4x384xbf16> to vector<4x384xbf16>
    %c20_18 = arith.constant 20 : index
    %c0_19 = arith.constant 0 : index
    %17 = vector.load %arg5[%c20_18, %c0_19] : memref<36x768xbf16, #tpu.memory_space<vmem>>, vector<4x384xbf16>
    tpu.vector_store %arg5[%c20_18, %c0_19], %16 {strides = array<i32>} : memref<36x768xbf16, #tpu.memory_space<vmem>>, vector<4x384xbf16>,
    %c0_20 = arith.constant 0 : index
    %c0_21 = arith.constant 0 : index
    %c36 = arith.constant 36 : index
    %18 = vector.load %arg1[%c0_20, %c0_21, %c36] : memref<1x8x432xbf16, #tpu.memory_space<vmem>>, vector<1x4x384xbf16>
    %19 = vector.shape_cast %18 : vector<1x4x384xbf16> to vector<4x384xbf16>
    %c24 = arith.constant 24 : index
    %c0_22 = arith.constant 0 : index
    %20 = vector.load %arg5[%c24, %c0_22] : memref<36x768xbf16, #tpu.memory_space<vmem>>, vector<4x384xbf16>
    tpu.vector_store %arg5[%c24, %c0_22], %19 {strides = array<i32>} : memref<36x768xbf16, #tpu.memory_space<vmem>>, vector<4x384xbf16>,
    %c0_23 = arith.constant 0 : index
    %c0_24 = arith.constant 0 : index
    %c37 = arith.constant 37 : index
    %21 = vector.load %arg1[%c0_23, %c0_24, %c37] : memref<1x8x432xbf16, #tpu.memory_space<vmem>>, vector<1x4x384xbf16>
    %22 = vector.shape_cast %21 : vector<1x4x384xbf16> to vector<4x384xbf16>
    %c28 = arith.constant 28 : index
    %c0_25 = arith.constant 0 : index
    %23 = vector.load %arg5[%c28, %c0_25] : memref<36x768xbf16, #tpu.memory_space<vmem>>, vector<4x384xbf16>
    tpu.vector_store %arg5[%c28, %c0_25], %22 {strides = array<i32>} : memref<36x768xbf16, #tpu.memory_space<vmem>>, vector<4x384xbf16>,
    %c0_26 = arith.constant 0 : index
    %c0_27 = arith.constant 0 : index
    %c38 = arith.constant 38 : index
    %24 = vector.load %arg1[%c0_26, %c0_27, %c38] : memref<1x8x432xbf16, #tpu.memory_space<vmem>>, vector<1x4x384xbf16>
    %25 = vector.shape_cast %24 : vector<1x4x384xbf16> to vector<4x384xbf16>
    %c32 = arith.constant 32 : index
    %c0_28 = arith.constant 0 : index
    %26 = vector.load %arg5[%c32, %c0_28] : memref<36x768xbf16, #tpu.memory_space<vmem>>, vector<4x384xbf16>
    tpu.vector_store %arg5[%c32, %c0_28], %25 {strides = array<i32>} : memref<36x768xbf16, #tpu.memory_space<vmem>>, vector<4x384xbf16>,
    %c0_29 = arith.constant 0 : index
    %c4_30 = arith.constant 4 : index
    %c0_31 = arith.constant 0 : index
    %27 = vector.load %arg1[%c0_29, %c4_30, %c0_31] : memref<1x8x432xbf16, #tpu.memory_space<vmem>>, vector<1x4x384xbf16>
    %28 = vector.shape_cast %27 : vector<1x4x384xbf16> to vector<4x384xbf16>
    %c0_32 = arith.constant 0 : index
    %c384 = arith.constant 384 : index
    %29 = vector.load %arg5[%c0_32, %c384] : memref<36x768xbf16, #tpu.memory_space<vmem>>, vector<4x384xbf16>
    tpu.vector_store %arg5[%c0_32, %c384], %28 {strides = array<i32>} : memref<36x768xbf16, #tpu.memory_space<vmem>>, vector<4x384xbf16>,
    %c0_33 = arith.constant 0 : index
    %c4_34 = arith.constant 4 : index
    %c1_35 = arith.constant 1 : index
    %30 = vector.load %arg1[%c0_33, %c4_34, %c1_35] : memref<1x8x432xbf16, #tpu.memory_space<vmem>>, vector<1x4x384xbf16>
    %31 = vector.shape_cast %30 : vector<1x4x384xbf16> to vector<4x384xbf16>
    %c4_36 = arith.constant 4 : index
    %c384_37 = arith.constant 384 : index
    %32 = vector.load %arg5[%c4_36, %c384_37] : memref<36x768xbf16, #tpu.memory_space<vmem>>, vector<4x384xbf16>
    tpu.vector_store %arg5[%c4_36, %c384_37], %31 {strides = array<i32>} : memref<36x768xbf16, #tpu.memory_space<vmem>>, vector<4x384xbf16>,
    %c0_38 = arith.constant 0 : index
    %c4_39 = arith.constant 4 : index
    %c2_40 = arith.constant 2 : index
    %33 = vector.load %arg1[%c0_38, %c4_39, %c2_40] : memref<1x8x432xbf16, #tpu.memory_space<vmem>>, vector<1x4x384xbf16>
    %34 = vector.shape_cast %33 : vector<1x4x384xbf16> to vector<4x384xbf16>
    %c8_41 = arith.constant 8 : index
    %c384_42 = arith.constant 384 : index
    %35 = vector.load %arg5[%c8_41, %c384_42] : memref<36x768xbf16, #tpu.memory_space<vmem>>, vector<4x384xbf16>
    tpu.vector_store %arg5[%c8_41, %c384_42], %34 {strides = array<i32>} : memref<36x768xbf16, #tpu.memory_space<vmem>>, vector<4x384xbf16>,
    %c0_43 = arith.constant 0 : index
    %c4_44 = arith.constant 4 : index
    %c18_45 = arith.constant 18 : index
    %36 = vector.load %arg1[%c0_43, %c4_44, %c18_45] : memref<1x8x432xbf16, #tpu.memory_space<vmem>>, vector<1x4x384xbf16>
    %37 = vector.shape_cast %36 : vector<1x4x384xbf16> to vector<4x384xbf16>
    %c12_46 = arith.constant 12 : index
    %c384_47 = arith.constant 384 : index
    %38 = vector.load %arg5[%c12_46, %c384_47] : memref<36x768xbf16, #tpu.memory_space<vmem>>, vector<4x384xbf16>
    tpu.vector_store %arg5[%c12_46, %c384_47], %37 {strides = array<i32>} : memref<36x768xbf16, #tpu.memory_space<vmem>>, vector<4x384xbf16>,
    %c0_48 = arith.constant 0 : index
    %c4_49 = arith.constant 4 : index
    %c19_50 = arith.constant 19 : index
    %39 = vector.load %arg1[%c0_48, %c4_49, %c19_50] : memref<1x8x432xbf16, #tpu.memory_space<vmem>>, vector<1x4x384xbf16>
    %40 = vector.shape_cast %39 : vector<1x4x384xbf16> to vector<4x384xbf16>
    %c16_51 = arith.constant 16 : index
    %c384_52 = arith.constant 384 : index
    %41 = vector.load %arg5[%c16_51, %c384_52] : memref<36x768xbf16, #tpu.memory_space<vmem>>, vector<4x384xbf16>
    tpu.vector_store %arg5[%c16_51, %c384_52], %40 {strides = array<i32>} : memref<36x768xbf16, #tpu.memory_space<vmem>>, vector<4x384xbf16>,
    %c0_53 = arith.constant 0 : index
    %c4_54 = arith.constant 4 : index
    %c20_55 = arith.constant 20 : index
    %42 = vector.load %arg1[%c0_53, %c4_54, %c20_55] : memref<1x8x432xbf16, #tpu.memory_space<vmem>>, vector<1x4x384xbf16>
    %43 = vector.shape_cast %42 : vector<1x4x384xbf16> to vector<4x384xbf16>
    %c20_56 = arith.constant 20 : index
    %c384_57 = arith.constant 384 : index
    %44 = vector.load %arg5[%c20_56, %c384_57] : memref<36x768xbf16, #tpu.memory_space<vmem>>, vector<4x384xbf16>
    tpu.vector_store %arg5[%c20_56, %c384_57], %43 {strides = array<i32>} : memref<36x768xbf16, #tpu.memory_space<vmem>>, vector<4x384xbf16>,
    %c0_58 = arith.constant 0 : index
    %c4_59 = arith.constant 4 : index
    %c36_60 = arith.constant 36 : index
    %45 = vector.load %arg1[%c0_58, %c4_59, %c36_60] : memref<1x8x432xbf16, #tpu.memory_space<vmem>>, vector<1x4x384xbf16>
    %46 = vector.shape_cast %45 : vector<1x4x384xbf16> to vector<4x384xbf16>
    %c24_61 = arith.constant 24 : index
    %c384_62 = arith.constant 384 : index
    %47 = vector.load %arg5[%c24_61, %c384_62] : memref<36x768xbf16, #tpu.memory_space<vmem>>, vector<4x384xbf16>
    tpu.vector_store %arg5[%c24_61, %c384_62], %46 {strides = array<i32>} : memref<36x768xbf16, #tpu.memory_space<vmem>>, vector<4x384xbf16>,
    %c0_63 = arith.constant 0 : index
    %c4_64 = arith.constant 4 : index
    %c37_65 = arith.constant 37 : index
    %48 = vector.load %arg1[%c0_63, %c4_64, %c37_65] : memref<1x8x432xbf16, #tpu.memory_space<vmem>>, vector<1x4x384xbf16>
    %49 = vector.shape_cast %48 : vector<1x4x384xbf16> to vector<4x384xbf16>
    %c28_66 = arith.constant 28 : index
    %c384_67 = arith.constant 384 : index
    %50 = vector.load %arg5[%c28_66, %c384_67] : memref<36x768xbf16, #tpu.memory_space<vmem>>, vector<4x384xbf16>
    tpu.vector_store %arg5[%c28_66, %c384_67], %49 {strides = array<i32>} : memref<36x768xbf16, #tpu.memory_space<vmem>>, vector<4x384xbf16>,
    %c0_68 = arith.constant 0 : index
    %c4_69 = arith.constant 4 : index
    %c38_70 = arith.constant 38 : index
    %51 = vector.load %arg1[%c0_68, %c4_69, %c38_70] : memref<1x8x432xbf16, #tpu.memory_space<vmem>>, vector<1x4x384xbf16>
    %52 = vector.shape_cast %51 : vector<1x4x384xbf16> to vector<4x384xbf16>
    %c32_71 = arith.constant 32 : index
    %c384_72 = arith.constant 384 : index
    %53 = vector.load %arg5[%c32_71, %c384_72] : memref<36x768xbf16, #tpu.memory_space<vmem>>, vector<4x384xbf16>
    tpu.vector_store %arg5[%c32_71, %c384_72], %52 {strides = array<i32>} : memref<36x768xbf16, #tpu.memory_space<vmem>>, vector<4x384xbf16>,
    %c0_73 = arith.constant 0 : index
    %c0_74 = arith.constant 0 : index
    %54 = vector.load %arg2[%c0_73, %c0_74] : memref<8x36xbf16, #tpu.memory_space<vmem>>, vector<8x36xbf16>
    %c0_75 = arith.constant 0 : index
    %c0_76 = arith.constant 0 : index
    %55 = vector.load %arg5[%c0_75, %c0_76] : memref<36x768xbf16, #tpu.memory_space<vmem>>, vector<36x768xbf16>
    %cst = arith.constant dense<0.000000e+00> : vector<8x768xf32>
    %56 = tpu.matmul %54, %55, %cst {dimension_numbers = #tpu.dot_dimension_numbers<[1], [0], [0], [1], [0, 0, 1, 1], [], []>} : vector<8x36xbf16>, vector<36x768xbf16>, vector<8x768xf32> -> vector<8x768xf32>
    %c0_77 = arith.constant 0 : index
    %c0_78 = arith.constant 0 : index
    %57 = vector.load %arg3[%c0_77, %c0_78] : memref<8x1xf32, #tpu.memory_space<vmem>>, vector<8x1xf32>
    %58 = vector.broadcast %57 : vector<8x1xf32> to vector<8x768xf32>
    %59 = arith.addf %56, %58 : vector<8x768xf32>
    %cst_79 = arith.constant 0.000000e+00 : f32
    %60 = vector.broadcast %cst_79 : f32 to vector<8x768xf32>
    %61 = arith.maximumf %59, %60 : vector<8x768xf32>
    %62 = tpu.iota {dimensions = array<i32: 1>} : vector<1x384xi32>
    %c288_i32 = arith.constant 288 : i32
    %63 = vector.broadcast %c288_i32 : i32 to vector<1x384xi32>
    %64 = arith.cmpi slt, %62, %63 : vector<1x384xi32>
    %c18_i32 = arith.constant 18 : i32
    %c0_i32 = arith.constant 0 : i32
    %65 = arith.cmpi eq, %c18_i32, %c0_i32 : i32
    %c1_i32 = arith.constant 1 : i32
    %66 = arith.select %65, %c1_i32, %c18_i32 : i32
    %67 = vector.broadcast %66 : i32 to vector<1x384xi32>
    %68 = arith.remsi %62, %67 : vector<1x384xi32>
    %c0_i32_80 = arith.constant 0 : i32
    %69 = vector.broadcast %c0_i32_80 : i32 to vector<1x384xi32>
    %70 = arith.cmpi ne, %68, %69 : vector<1x384xi32>
    %c0_i32_81 = arith.constant 0 : i32
    %71 = vector.broadcast %c0_i32_81 : i32 to vector<1x384xi32>
    %72 = arith.cmpi slt, %68, %71 : vector<1x384xi32>
    %c0_i32_82 = arith.constant 0 : i32
    %73 = arith.cmpi slt, %66, %c0_i32_82 : i32
    %74 = vector.broadcast %73 : i1 to vector<1x384xi1>
    %75 = vector.broadcast %74 : vector<1x384xi1> to vector<1x384xi1>
    %76 = arith.xori %72, %75 : vector<1x384xi1>
    %77 = arith.andi %76, %70 : vector<1x384xi1>
    %78 = vector.broadcast %66 : i32 to vector<1x384xi32>
    %79 = arith.addi %68, %78 : vector<1x384xi32>
    %80 = arith.select %77, %79, %68 : vector<1x384xi1>, vector<1x384xi32>
    %c16_i32 = arith.constant 16 : i32
    %81 = vector.broadcast %c16_i32 : i32 to vector<1x384xi32>
    %82 = arith.cmpi slt, %80, %81 : vector<1x384xi32>
    %83 = arith.andi %64, %82 : vector<1x384xi1>
    %84 = arith.extui %83 : vector<1x384xi1> to vector<1x384xi32>
    %85 = arith.sitofp %84 : vector<1x384xi32> to vector<1x384xf32>
    %86 = vector.extract_strided_slice %61 {offsets = [0, 0], sizes = [8, 384], strides = [1, 1]} : vector<8x768xf32> to vector<8x384xf32>
    %87 = vector.extract_strided_slice %61 {offsets = [0, 384], sizes = [8, 384], strides = [1, 1]} : vector<8x768xf32> to vector<8x384xf32>
    %88 = arith.subf %87, %86 : vector<8x384xf32>
    %89 = math.absf %88 : vector<8x384xf32>
    %90 = vector.broadcast %85 : vector<1x384xf32> to vector<8x384xf32>
    %91 = arith.mulf %89, %90 : vector<8x384xf32>
    %cst_83 = arith.constant dense<0.000000e+00> : vector<8xf32>
    %92 = vector.multi_reduction <add>, %91, %cst_83 [1] : vector<8x384xf32> to vector<8xf32>
    %93 = vector.shape_cast %92 : vector<8xf32> to vector<8x1xf32>
    %cst_84 = arith.constant dense<0.000000e+00> : vector<1xf32>
    %94 = vector.multi_reduction <add>, %93, %cst_84 [0] : vector<8x1xf32> to vector<1xf32>
    %95 = vector.shape_cast %94 : vector<1xf32> to vector<1x1xf32>
    %cst_85 = arith.constant 4.88281257E-5 : f32
    %96 = vector.broadcast %cst_85 : f32 to vector<1x1xf32>
    %97 = arith.mulf %95, %96 : vector<1x1xf32>
    %98 = vector.shape_cast %97 : vector<1x1xf32> to vector<1x1xf32>
    %99 = vector.broadcast %98 : vector<1x1xf32> to vector<1x128xf32>
    %c0_86 = arith.constant 0 : index
    %c0_87 = arith.constant 0 : index
    %c0_88 = arith.constant 0 : index
    %100 = vector.load %arg4[%c0_86, %c0_87, %c0_88] : memref<1x1x128xf32, #tpu.memory_space<vmem>>, vector<1x1x128xf32>
    %101 = vector.shape_cast %100 : vector<1x1x128xf32> to vector<1x128xf32>
    %102 = vector.shape_cast %99 : vector<1x128xf32> to vector<1x1x128xf32>
    tpu.vector_store %arg4[%c0_86, %c0_87, %c0_88], %102 {strides = array<i32>} : memref<1x1x128xf32, #tpu.memory_space<vmem>>, vector<1x1x128xf32>,
    return
  }
  func.func @transform_0(%arg0: i32) -> (i32, i32, i32) {
    %c0_i32 = arith.constant 0 : i32
    %c0_i32_0 = arith.constant 0 : i32
    %c0_i32_1 = arith.constant 0 : i32
    return %arg0, %c0_i32, %c0_i32_0 : i32, i32, i32
  }
  func.func @transform_1(%arg0: i32) -> (i32, i32) {
    %c0_i32 = arith.constant 0 : i32
    %c0_i32_0 = arith.constant 0 : i32
    %c0_i32_1 = arith.constant 0 : i32
    return %c0_i32, %c0_i32_0 : i32, i32
  }
  func.func @transform_2(%arg0: i32) -> (i32, i32) {
    %c0_i32 = arith.constant 0 : i32
    %c0_i32_0 = arith.constant 0 : i32
    %c0_i32_1 = arith.constant 0 : i32
    return %c0_i32, %c0_i32_0 : i32, i32
  }
  func.func @transform_3(%arg0: i32) -> (i32, i32, i32) {
    %c0_i32 = arith.constant 0 : i32
    %c0_i32_0 = arith.constant 0 : i32
    %c0_i32_1 = arith.constant 0 : i32
    return %arg0, %c0_i32, %c0_i32_0 : i32, i32, i32
  }
}

</mosaic_0001>

<bundles_post_ra>
// kernel: perceptual_loss.1
= control target key start
LH: loop header
LB: loop body
LE: loop exit
PB: predicated region body
PF: predicated region fallthrough
CT: control target
= control target key end

     0   :  { %s1007_s12 = smov 0   ;;  %s1207_s0 = inlined_call_operand.vmem [shape: bf16[2,8,432], index: 0, kind: input, shape index: {}]   ;;  %s1208_s1 = inlined_call_operand.vmem [shape: bf16[8,36], index: 1, kind: input, shape index: {}]   ;;  %s1209_s2 = inlined_call_operand.vmem [shape: f32[8,1], index: 2, kind: input, shape index: {}]   ;;  %s1210_s3 = inlined_call_operand.vmem [shape: f32[2,1,128], index: 3, kind: output, shape index: {}]  }
   0x1 LB: > { %s873_s13 = sadd.s32 4294967295, %s975_s12   ;;  %p877_p0 = scmp.ge.s32.totalorder %s975_s12, 1  ;;  %s975_s12 = sphi %s1007_s12, %s13_s12  }
   0x2   : > { %p137_p1 = scmp.lt.s32.totalorder %s975_s12, 3 }
   0x4   : > { %p138_p2 = pnand %p877_p0, %p137_p1 }
   0x5   : > { %p159_p3 = scmp.lt.s32.totalorder (!%p138_p2), %s873_s13, 1  ;;  %s977_s18 = smov (!%p138_p2), 126   ;;  %v985_v42 = vmov (!%p138_p2), 0   ;;  %v505_v55 = vld [vmem:[%s1209_s2] sm:$0xff] (!%p138_p2)  ;;  %vm184_vm0 = vcmask (!%p138_p2), 1043456   ;;  %vm204_vm1 = vcmask (!%p138_p2), 1031168  }
   0x6   : > { %141 = sbr.rel (%p138_p2) target bundleno = 597 (0x255), region = 32  ;;  %s978_s19 = smov (!%p138_p2), 127   ;;  %641 = vmatprep.mubr.bf16.mxu0 (!%p138_p2), %v985_v42  ;;  %682 = vmatprep.mubr.bf16.mxu1 (!%p138_p2), %v985_v42  ;;  %vm186_vm2 = vcmask (!%p138_p2), 1039360   ;;  %vm224_vm3 = vcmask (!%p138_p2), 900096   ;;  %vm242_vm4 = vcmask (!%p138_p2), 891904   ;;  %vm262_vm5 = vcmask (!%p138_p2), 883712  }
   0x7   : > { %s979_s20 = smov (!%p138_p2), 110   ;;  %s980_s21 = smov (!%p138_p2), 109   ;;  %944 = vset.pattern.permute.xlu0 (!%p138_p2), %v985_v42  ;;  %vm280_vm6 = vcmask (!%p138_p2), 752640   ;;  %vm300_vm7 = vcmask (!%p138_p2), 744448   ;;  %vm318_vm8 = vcmask (!%p138_p2), 736256   ;;  %vm590_vm9 = vcmask (!%p138_p2), 1041408  }
   0x8   : > { %s981_s22 = smov (!%p138_p2), 108   ;;  %s982_s23 = smov (!%p138_p2), 92   ;;  %vm586_vm10 = vcmask (!%p138_p2), 293888  }
   0x9   : > { %s983_s24 = smov (!%p138_p2), 91   ;;  %s984_s25 = smov (!%p138_p2), 90  }
   0xd   : > { %s1220_s13 = smov (!%p159_p3, %s873_s13), 1 }
   0xe   : > { %s919_s14 = sshll.u32 %s1220_s13, 4  ;;  %s166_s5 = scalar_lea.vmem %s1210_s3, %s1220_s13 }
   0xf   : > { %s1021_s17 = scalar_lea.vmem %s1207_s0, %s919_s14 }
  0x10   : > { %v193_v0 = vld [vmem:[%s1021_s17] sm:$0x33]  ;;  %v173_v3 = vld [vmem:[%s1021_s17 + $0x8] sm:$0x33]  ;;  %v325_v23 = vld [vmem:[%s1021_s17] sm:$0xcc] }
  0x11   : > { %v172_v1 = vld [vmem:[%s1021_s17] sm:$0x33]  ;;  %197 = vrot.lane.b32.xlu1 %v193_v0, %s977_s18  ;;  %v194_v4 = vld [vmem:[%s1021_s17 + $0x8] sm:$0x33]  ;;  %v177_v6 = vrot.slane %v173_v3, 6  ;;  %v880_v25 = vrot.slane %v325_v23, 10 }
  0x12   : > { %v176_v2 = vrot.slane %v172_v1, 6  ;;  %v212_v5 = vld [vmem:[%s1021_s17 + $0x8] sm:$0x33]  ;;  %v211_v7 = vld [vmem:[%s1021_s17] sm:$0x33] }
  0x13   : > { %v216_v8 = vrot.slane %v212_v5, 6  ;;  %v215_v9 = vrot.slane %v211_v7, 6  ;;  %v232_v10 = vld [vmem:[%s1021_s17 + $0x8] sm:$0x33]  ;;  %v231_v12 = vld [vmem:[%s1021_s17] sm:$0x33] }
  0x14   : > { %178 = vrot.lane.b32.xlu0 %v176_v2, %s978_s19  ;;  %v250_v11 = vld [vmem:[%s1021_s17 + $0x8] sm:$0x33]  ;;  %v249_v13 = vld [vmem:[%s1021_s17] sm:$0x33]  ;;  %v326_v24 = vld [vmem:[%s1021_s17 + $0x8] sm:$0xc] }
  0x15   : > { %199 = vrot.lane.b32.xlu1 %v194_v4, %s977_s18  ;;  %v254_v14 = vrot.slane %v250_v11, 6  ;;  %v168_v15 = vld [vmem:[%s1021_s17] sm:$0x33]  ;;  %v253_v16 = vrot.slane %v249_v13, 6  ;;  %v270_v17 = vld [vmem:[%s1021_s17 + $0x8] sm:$0x33] }
  0x16   : > { %170 = vst [vmem:[#allocation2] sm:$0x33] %v168_v15  ;;  %v288_v18 = vld [vmem:[%s1021_s17 + $0x8] sm:$0x33]  ;;  %v269_v19 = vld [vmem:[%s1021_s17] sm:$0x33] }
  0x17   : > { %v287_v20 = vld [vmem:[%s1021_s17] sm:$0x33]  ;;  %v292_v21 = vrot.slane %v288_v18, 6  ;;  %v881_v26 = vrot.slane %v326_v24, 10  ;;  %v169_v27 = vld [vmem:[%s1021_s17 + $0x8] sm:$0x3] }
  0x18   : > { %180 = vrot.lane.b32.xlu0 %v177_v6, %s978_s19  ;;  %v291_v22 = vrot.slane %v287_v20, 6  ;;  %v308_v28 = vld [vmem:[%s1021_s17 + $0x8] sm:$0x33]  ;;  %171 = vst [vmem:[#allocation2 + $0x8] sm:$0x3] %v169_v27 }
  0x19   : > { %219 = vrot.lane.b32.xlu1 %v216_v8, %s979_s20  ;;  %335 = vst [vmem:[#allocation2 + $0xc] sm:$0x33] %v880_v25  ;;  %336 = vst [vmem:[#allocation2 + $0x14] sm:$0x3] %v881_v26  ;;  %v307_v29 = vld [vmem:[%s1021_s17] sm:$0x33] }
  0x1a   : > { %v338_v30 = vld [vmem:[%s1021_s17 + $0x8] sm:$0xcc]  ;;  %v337_v32 = vld [vmem:[%s1021_s17] sm:$0xcc] }
  0x1b   : > { %v355_v31 = vld [vmem:[%s1021_s17 + $0x8] sm:$0xcc]  ;;  %v354_v33 = vld [vmem:[%s1021_s17] sm:$0xcc] }
  0x1c   : > { %217 = vrot.lane.b32.xlu0 %v215_v9, %s979_s20  ;;  %v883_v34 = vrot.slane %v355_v31, 10  ;;  %v882_v35 = vrot.slane %v354_v33, 10  ;;  %v376_v36 = vld [vmem:[%s1021_s17 + $0x8] sm:$0xcc]  ;;  %v375_v38 = vld [vmem:[%s1021_s17] sm:$0xcc] }
  0x1d   : > { %237 = vrot.lane.b32.xlu1 %v232_v10, %s980_s21  ;;  %v393_v37 = vld [vmem:[%s1021_s17 + $0x8] sm:$0xcc]  ;;  %v392_v39 = vld [vmem:[%s1021_s17] sm:$0xcc] }
  0x1e   : > { %v885_v40 = vrot.slane %v393_v37, 10  ;;  %v884_v41 = vrot.slane %v392_v39, 10  ;;  %v414_v43 = vld [vmem:[%s1021_s17 + $0x8] sm:$0xcc]  ;;  %v413_v45 = vld [vmem:[%s1021_s17] sm:$0xcc] }
  0x1f   : > { %v431_v44 = vld [vmem:[%s1021_s17 + $0x8] sm:$0xcc]  ;;  %v430_v46 = vld [vmem:[%s1021_s17] sm:$0xcc] }
  0x20   : > { %235 = vrot.lane.b32.xlu0 %v231_v12, %s980_s21  ;;  %v887_v47 = vrot.slane %v431_v44, 10  ;;  %v886_v48 = vrot.slane %v430_v46, 10  ;;  %v452_v49 = vld [vmem:[%s1021_s17 + $0x8] sm:$0xcc]  ;;  %v451_v51 = vld [vmem:[%s1021_s17] sm:$0xcc] }
  0x21   : > { %257 = vrot.lane.b32.xlu1 %v254_v14, %s981_s22  ;;  %v469_v50 = vld [vmem:[%s1021_s17 + $0x8] sm:$0xcc]  ;;  %v468_v52 = vld [vmem:[%s1021_s17] sm:$0xcc] }
  0x22   : > { %v889_v53 = vrot.slane %v469_v50, 10  ;;  %v888_v54 = vrot.slane %v468_v52, 10 }
  0x24   : > { %255 = vrot.lane.b32.xlu0 %v253_v16, %s981_s22 }
  0x25   : > { %275 = vrot.lane.b32.xlu1 %v270_v17, %s982_s23 }
  0x28   : > { %273 = vrot.lane.b32.xlu0 %v269_v19, %s982_s23 }
  0x29   : > { %295 = vrot.lane.b32.xlu1 %v292_v21, %s983_s24 }
  0x2c   : > { %293 = vrot.lane.b32.xlu0 %v291_v22, %s983_s24 }
  0x2d   : > { %313 = vrot.lane.b32.xlu1 %v308_v28, %s984_s25 }
  0x30   : > { %311 = vrot.lane.b32.xlu0 %v307_v29, %s984_s25 }
  0x31   : > { %343 = vrot.lane.b32.xlu1 %v338_v30, %s978_s19 }
  0x34   : > { %341 = vrot.lane.b32.xlu0 %v337_v32, %s978_s19 }
  0x35   : > { %364 = vrot.lane.b32.xlu1 %v883_v34, %s977_s18 }
  0x38   : > { %362 = vrot.lane.b32.xlu0 %v882_v35, %s977_s18 }
  0x39   : > { %381 = vrot.lane.b32.xlu1 %v376_v36, %s979_s20 }
  0x3c   : > { %379 = vrot.lane.b32.xlu0 %v375_v38, %s979_s20 }
  0x3d   : > { %402 = vrot.lane.b32.xlu1 %v885_v40, %s980_s21 }
  0x40   : > { %400 = vrot.lane.b32.xlu0 %v884_v41, %s980_s21 }
  0x41   : > { %419 = vrot.lane.b32.xlu1 %v414_v43, %s981_s22 }
  0x44   : > { %417 = vrot.lane.b32.xlu0 %v413_v45, %s981_s22 }
  0x45   : > { %440 = vrot.lane.b32.xlu1 %v887_v47, %s982_s23 }
  0x48   : > { %438 = vrot.lane.b32.xlu0 %v886_v48, %s982_s23 }
  0x49   : > { %457 = vrot.lane.b32.xlu1 %v452_v49, %s983_s24 }
  0x4c   : > { %455 = vrot.lane.b32.xlu0 %v451_v51, %s983_s24 }
  0x4d   : > { %478 = vrot.lane.b32.xlu1 %v889_v53, %s984_s25 }
  0x50   : > { %476 = vrot.lane.b32.xlu0 %v888_v54, %s984_s25 }
  0x54   : > { %508 = vperm.xlu0 %944, %v505_v55  }
  0x83   : > { %v198_v56 = vpop.permute.xlu1 %197 }
  0x84   : > { %v201_v59 = vrot.slane %v198_v56, 4 }
  0x86   : > { %v179_v57 = vpop.permute.xlu0 %178 }
  0x87   : > { %v200_v58 = vpop.permute.xlu1 %199  ;;  %v182_v62 = vrot.slane %v179_v57, 4 }
  0x88   : > { %v202_v60 = vrot.slane %v200_v58, 4 }
  0x8a   : > { %v181_v61 = vpop.permute.xlu0 %180  ;;  %v203_v63 = vsel %vm184_vm0, %v201_v59, %v202_v60  ;;  %v206_v0 = vsel %vm204_vm1, %v200_v58, %v202_v60 }
  0x8b   : > { %v183_v1 = vrot.slane %v181_v61, 4  ;;  %v205_v2 = vsel %vm204_vm1, %v198_v56, %v203_v63  ;;  %210 = vst [vmem:[#allocation2 + $0x20] sm:$0x3] %v206_v0  ;;  %v220_v3 = vpop.permute.xlu1 %219 }
  0x8c   : > { %209 = vst [vmem:[#allocation2 + $0x18] sm:$0x33] %v205_v2  ;;  %v222_v6 = vrot.slane %v220_v3, 4 }
  0x8d   : > { %v185_v4 = vsel %vm184_vm0, %v182_v62, %v183_v1  ;;  %v188_v5 = vsel %vm186_vm2, %v181_v61, %v183_v1 }
  0x8e   : > { %v187_v7 = vsel %vm186_vm2, %v179_v57, %v185_v4  ;;  %192 = vst [vmem:[#allocation2 + $0x8] sm:$0xc] %v188_v5  ;;  %v218_v8 = vpop.permute.xlu0 %217  ;;  %v226_v9 = vsel %vm224_vm3, %v220_v3, %v222_v6 }
  0x8f   : > { %191 = vst [vmem:[#allocation2] sm:$0xcc] %v187_v7  ;;  %v221_v10 = vrot.slane %v218_v8, 4  ;;  %230 = vst [vmem:[#allocation2 + $0x20] sm:$0xc] %v226_v9  ;;  %v238_v11 = vpop.permute.xlu1 %237 }
  0x90   : > { %v240_v13 = vrot.slane %v238_v11, 4 }
  0x91   : > { %v223_v12 = vsel %vm184_vm0, %v221_v10, %v222_v6 }
  0x92   : > { %v225_v14 = vsel %vm224_vm3, %v218_v8, %v223_v12  ;;  %v236_v15 = vpop.permute.xlu0 %235  ;;  %v244_v16 = vsel %vm242_vm4, %v238_v11, %v240_v13 }
  0x93   : > { %229 = vst [vmem:[#allocation2 + $0x18] sm:$0xcc] %v225_v14  ;;  %v239_v17 = vrot.slane %v236_v15, 4  ;;  %248 = vst [vmem:[#allocation2 + $0x38] sm:$0x3] %v244_v16  ;;  %v258_v18 = vpop.permute.xlu1 %257 }
  0x94   : > { %v260_v20 = vrot.slane %v258_v18, 4 }
  0x95   : > { %v241_v19 = vsel %vm184_vm0, %v239_v17, %v240_v13  ;;  %v1135_v17 = vld [vmem:[%s1208_s1] sm:$0xf] }
  0x96   : > { %v243_v21 = vsel %vm242_vm4, %v236_v15, %v241_v19  ;;  %v256_v22 = vpop.permute.xlu0 %255  ;;  %v264_v23 = vsel %vm262_vm5, %v258_v18, %v260_v20 }
  0x97   : > { %247 = vst [vmem:[#allocation2 + $0x30] sm:$0x33] %v243_v21  ;;  %v259_v24 = vrot.slane %v256_v22, 4  ;;  %268 = vst [vmem:[#allocation2 + $0x38] sm:$0xc] %v264_v23  ;;  %v276_v25 = vpop.permute.xlu1 %275 }
  0x98   : > { %v278_v27 = vrot.slane %v276_v25, 4 }
  0x99   : > { %v261_v26 = vsel %vm184_vm0, %v259_v24, %v260_v20 }
  0x9a   : > { %v263_v28 = vsel %vm262_vm5, %v256_v22, %v261_v26  ;;  %v274_v29 = vpop.permute.xlu0 %273  ;;  %v945_v30 = vld [vmem:[#allocation2 + $0x4] ss:$24 sps:$4 sm:$0xff]   ;;  %v947_v31 = vld [vmem:[#allocation2] ss:$24 sps:$4 sm:$0xff]   ;;  %v282_v32 = vsel %vm280_vm6, %v276_v25, %v278_v27 }
  0x9b   : > { %267 = vst [vmem:[#allocation2 + $0x30] sm:$0xcc] %v263_v28  ;;  %v277_v33 = vrot.slane %v274_v29, 4  ;;  %286 = vst [vmem:[#allocation2 + $0x50] sm:$0x3] %v282_v32  ;;  %v296_v34 = vpop.permute.xlu1 %295  ;;  %609 = vmatprep.subr.bf16.mxu0 %v945_v30 }
  0x9c   : > { %v298_v36 = vrot.slane %v296_v34, 4  ;;  %610 = vmatpush1.bf16.msra.mxu0 %v947_v31 }
  0x9d   : > { %v279_v35 = vsel %vm184_vm0, %v277_v33, %v278_v27 }
  0x9e   : > { %v281_v37 = vsel %vm280_vm6, %v274_v29, %v279_v35  ;;  %v294_v38 = vpop.permute.xlu0 %293  ;;  %v302_v39 = vsel %vm300_vm7, %v296_v34, %v298_v36 }
  0x9f   : > { %285 = vst [vmem:[#allocation2 + $0x48] sm:$0x33] %v281_v37  ;;  %v297_v40 = vrot.slane %v294_v38, 4  ;;  %306 = vst [vmem:[#allocation2 + $0x50] sm:$0xc] %v302_v39  ;;  %v314_v41 = vpop.permute.xlu1 %313 }
  0xa0   : > { %v316_v44 = vrot.slane %v314_v41, 4  ;;  %v958_v37 = vld [vmem:[#allocation2 + $0x8] ss:$24 sps:$4 sm:$0xff]  }
  0xa1   : > { %v299_v43 = vsel %vm184_vm0, %v297_v40, %v298_v36 }
  0xa2   : > { %v301_v45 = vsel %vm300_vm7, %v294_v38, %v299_v43  ;;  %v312_v46 = vpop.permute.xlu0 %311  ;;  %v320_v47 = vsel %vm318_vm8, %v314_v41, %v316_v44 }
  0xa3   : > { %305 = vst [vmem:[#allocation2 + $0x48] sm:$0xcc] %v301_v45  ;;  %v315_v48 = vrot.slane %v312_v46, 4  ;;  %324 = vst [vmem:[#allocation2 + $0x68] sm:$0x3] %v320_v47  ;;  %v344_v49 = vpop.permute.xlu1 %343 }
  0xa4   : > { %v346_v51 = vrot.slane %v344_v49, 4 }
  0xa5   : > { %v317_v50 = vsel %vm184_vm0, %v315_v48, %v316_v44 }
  0xa6   : > { %v319_v52 = vsel %vm318_vm8, %v312_v46, %v317_v50  ;;  %v342_v53 = vpop.permute.xlu0 %341  ;;  %v349_v54 = vsel %vm186_vm2, %v344_v49, %v346_v51 }
  0xa7   : > { %323 = vst [vmem:[#allocation2 + $0x60] sm:$0x33] %v319_v52  ;;  %v345_v55 = vrot.slane %v342_v53, 4  ;;  %353 = vst [vmem:[#allocation2 + $0x14] sm:$0xc] %v349_v54  ;;  %v365_v56 = vpop.permute.xlu1 %364 }
  0xa8   : > { %v367_v58 = vrot.slane %v365_v56, 4 }
  0xa9   : > { %v347_v57 = vsel %vm184_vm0, %v345_v55, %v346_v51 }
  0xaa   : > { %v348_v59 = vsel %vm186_vm2, %v342_v53, %v347_v57  ;;  %v363_v60 = vpop.permute.xlu0 %362  ;;  %v948_v61 = vld [vmem:[#allocation2 + $0x34] ss:$24 sps:$4 sm:$0xff]   ;;  %v950_v62 = vld [vmem:[#allocation2 + $0x30] ss:$24 sps:$4 sm:$0xff]   ;;  %v370_v63 = vsel %vm204_vm1, %v365_v56, %v367_v58 }
  0xab   : > { %352 = vst [vmem:[#allocation2 + $0xc] sm:$0xcc] %v348_v59  ;;  %v366_v0 = vrot.slane %v363_v60, 4  ;;  %374 = vst [vmem:[#allocation2 + $0x2c] sm:$0x3] %v370_v63  ;;  %v382_v1 = vpop.permute.xlu1 %381  ;;  %611 = vmatprep.subr.bf16.mxu0 %v948_v61 }
  0xac   : > { %v384_v3 = vrot.slane %v382_v1, 4  ;;  %612 = vmatpush1.bf16.msra.mxu0 %v950_v62  ;;  %v964_v57 = vld [vmem:[#allocation2 + $0x38] ss:$24 sps:$4 sm:$0xff]  }
  0xad   : > { %v368_v2 = vsel %vm184_vm0, %v366_v0, %v367_v58 }
  0xae   : > { %v369_v4 = vsel %vm204_vm1, %v363_v60, %v368_v2  ;;  %v380_v5 = vpop.permute.xlu0 %379  ;;  %v502_v6 = vld [vmem:[#allocation2 + $0x60] sm:$0x33]  ;;  %v387_v7 = vsel %vm224_vm3, %v382_v1, %v384_v3  ;;  %v738_v2 = vlaneseq }
  0xaf   : > { %373 = vst [vmem:[#allocation2 + $0x24] sm:$0x33] %v369_v4  ;;  %v383_v8 = vrot.slane %v380_v5, 4  ;;  %v903_v9 = vcombine.high %v502_v6, %v502_v6  ;;  %v902_v10 = vcombine.low %v502_v6, %v502_v6  ;;  %391 = vst [vmem:[#allocation2 + $0x2c] sm:$0xc] %v387_v7  ;;  %v403_v11 = vpop.permute.xlu1 %402 }
  0xb0   : > { %v405_v13 = vrot.slane %v403_v11, 4 }
  0xb1   : > { %v385_v12 = vsel %vm184_vm0, %v383_v8, %v384_v3  ;;  %908 = vmatprep.subr.msk.bf16.mxu0 %vm590_vm9, %v903_v9  ;;  %v592_v14 = vsel %vm590_vm9, %v902_v10, 0  ;;  %v739_v3 = vand.u32 127, %v738_v2 }
  0xb2   : > { %v386_v15 = vsel %vm224_vm3, %v380_v5, %v385_v12  ;;  %v401_v16 = vpop.permute.xlu0 %400  ;;  %614 = vmatpush1.bf16.msra.mxu0 %v592_v14  ;;  %v408_v18 = vsel %vm242_vm4, %v403_v11, %v405_v13 }
  0xb3   : > { %390 = vst [vmem:[#allocation2 + $0x24] sm:$0xcc] %v386_v15  ;;  %v404_v19 = vrot.slane %v401_v16, 4  ;;  %412 = vst [vmem:[#allocation2 + $0x44] sm:$0x3] %v408_v18  ;;  %v420_v20 = vpop.permute.xlu1 %419  ;;  %v740_v6 = vadd.s32 128, %v739_v3 }
  0xb4   : > { %v422_v22 = vrot.slane %v420_v20, 4  ;;  %v741_v8 = vadd.s32 256, %v739_v3  ;;  %v1169_v14 = vmul.u32.u64.low 3817748708, %v739_v3  ;;  %v1170_v15 = vmul.u32.u64.high 3817748708, %v739_v3, %v1169_v14 }
  0xb5   : > { %v406_v21 = vsel %vm184_vm0, %v404_v19, %v405_v13  ;;  %909 = vmatmul.mubr.msk.bf16.vlgmr.msra.gmra.mrb[0].mxu0 %vm586_vm10, %v1135_v17  ;;  %v1163_v10 = vmul.u32.u64.low 3817748708, %v740_v6  ;;  %v1164_v11 = vmul.u32.u64.high 3817748708, %v740_v6, %v1163_v10 }
  0xb6   : > { %v407_v23 = vsel %vm242_vm4, %v401_v16, %v406_v21  ;;  %v418_v24 = vpop.permute.xlu0 %417  ;;  %723 = vmatprep.mubr.bf16.mxu0 %v985_v42  ;;  %v425_v25 = vsel %vm262_vm5, %v420_v20, %v422_v22  ;;  %v957_v36 = vld [vmem:[#allocation2 + $0x14] ss:$24 sps:$4 sm:$0xff]   ;;  %v1166_v12 = vmul.u32.u64.low 3817748708, %v741_v8  ;;  %v1167_v13 = vmul.u32.u64.high 3817748708, %v741_v8, %v1166_v12 }
  0xb7   : > { %411 = vst [vmem:[#allocation2 + $0x3c] sm:$0x33] %v407_v23  ;;  %v421_v26 = vrot.slane %v418_v24, 4  ;;  %429 = vst [vmem:[#allocation2 + $0x44] sm:$0xc] %v425_v25  ;;  %v441_v27 = vpop.permute.xlu1 %440  ;;  %691 = vmatprep.subr.bf16.mxu0 %v957_v36  ;;  %v762_v16 = vshrl.u32 %v1164_v11, 4 }
  0xb8   : > { %v443_v29 = vrot.slane %v441_v27, 4  ;;  %v751_v18 = vshrl.u32 %v1170_v15, 4  ;;  %vm744_vm4 = vcmp.lt.s32.totalorder %v741_v8, 288 }
  0xb9   : > { %v423_v28 = vsel %vm184_vm0, %v421_v26, %v422_v22  ;;  %v763_v19 = vmul.u32 18, %v762_v16 }
  0xba   : > { %v424_v30 = vsel %vm262_vm5, %v418_v24, %v423_v28  ;;  %v439_v31 = vpop.permute.xlu0 %438  ;;  %v953_v32 = vld [vmem:[#allocation2 + $0xc] ss:$24 sps:$4 sm:$0xff]   ;;  %v446_v33 = vsel %vm280_vm6, %v441_v27, %v443_v29  ;;  %v955_v35 = vld [vmem:[#allocation2 + $0x10] ss:$24 sps:$4 sm:$0xff]   ;;  %v752_v21 = vmul.u32 18, %v751_v18 }
  0xbb   : > { %428 = vst [vmem:[#allocation2 + $0x3c] sm:$0xcc] %v424_v30  ;;  %v442_v34 = vrot.slane %v439_v31, 4  ;;  %450 = vst [vmem:[#allocation2 + $0x5c] sm:$0x3] %v446_v33  ;;  %v458_v42 = vpop.permute.xlu1 %457  ;;  %650 = vmatprep.subr.bf16.mxu1 %v953_v32  ;;  %692 = vmatpush1.bf16.msra.mxu0 %v955_v35  ;;  %v764_v22 = vsub.s32 %v740_v6, %v763_v19 }
  0xbc   : > { %v460_v39 = vrot.slane %v458_v42, 4  ;;  %651 = vmatpush1.bf16.msra.mxu1 %v958_v37  ;;  %v753_v24 = vsub.s32 %v739_v3, %v752_v21 }
  0xbd   : > { %v444_v38 = vsel %vm184_vm0, %v442_v34, %v443_v29  ;;  %vm779_vm11 = vcmp.ne.s32.totalorder %v764_v22, 0  ;;  %vm782_vm12 = vcmp.lt.s32.totalorder %v764_v22, 0  ;;  %v788_v25 = vadd.s32 18, %v764_v22 }
  0xbe   : > { %v445_v40 = vsel %vm280_vm6, %v439_v31, %v444_v38  ;;  %v456_v41 = vpop.permute.xlu0 %455  ;;  %v463_v43 = vsel %vm300_vm7, %v458_v42, %v460_v39  ;;  %vm778_vm15 = vcmp.ne.s32.totalorder %v753_v24, 0  ;;  %vm1175_vm1 = vmand %vm782_vm12, %vm779_vm11  ;;  %v787_v30 = vadd.s32 18, %v753_v24 }
  0xbf   : > { %449 = vst [vmem:[#allocation2 + $0x54] sm:$0x33] %v445_v40  ;;  %v459_v44 = vrot.slane %v456_v41, 4  ;;  %467 = vst [vmem:[#allocation2 + $0x5c] sm:$0xc] %v463_v43  ;;  %v479_v45 = vpop.permute.xlu1 %478  ;;  %v791_v33 = vsel %vm1175_vm1, %v788_v25, %v764_v22 }
  0xc0   : > { %v481_v47 = vrot.slane %v479_v45, 4  ;;  %vm1193_vm5 = vcmp.lt.s32.totalorder %v791_v33, 16 }
  0xc1   : > { %v461_v46 = vsel %vm184_vm0, %v459_v44, %v460_v39 }
  0xc2   : > { %v462_v48 = vsel %vm300_vm7, %v456_v41, %v461_v46  ;;  %v477_v49 = vpop.permute.xlu0 %476  ;;  %v484_v50 = vsel %vm318_vm8, %v479_v45, %v481_v47 }
  0xc3   : > { %466 = vst [vmem:[#allocation2 + $0x54] sm:$0xcc] %v462_v48  ;;  %v480_v51 = vrot.slane %v477_v49, 4  ;;  %488 = vst [vmem:[#allocation2 + $0x74] sm:$0x3] %v484_v50 }
  0xc5   : > { %v482_v52 = vsel %vm184_vm0, %v480_v51, %v481_v47  ;;  %vm781_vm0 = vcmp.lt.s32.totalorder %v753_v24, 0 }
  0xc6   : > { %v483_v53 = vsel %vm318_vm8, %v477_v49, %v482_v52  ;;  %v963_v56 = vld [vmem:[#allocation2 + $0x44] ss:$24 sps:$4 sm:$0xff]   ;;  %vm1183_vm3 = vmand %vm781_vm0, %vm778_vm15 }
  0xc7   : > { %487 = vst [vmem:[#allocation2 + $0x6c] sm:$0x33] %v483_v53  ;;  %693 = vmatprep.subr.bf16.mxu0 %v963_v56  ;;  %v790_v41 = vsel %vm1183_vm3, %v787_v30, %v753_v24 }
  0xc8   : > { %vm793_vm7 = vcmp.lt.s32.totalorder %v790_v41, 16 }
  0xca   : > { %v959_v54 = vld [vmem:[#allocation2 + $0x3c] ss:$24 sps:$4 sm:$0xff]   ;;  %v961_v55 = vld [vmem:[#allocation2 + $0x40] ss:$24 sps:$4 sm:$0xff]  }
  0xcb   : > { %652 = vmatprep.subr.bf16.mxu1 %v959_v54  ;;  %694 = vmatpush1.bf16.msra.mxu0 %v961_v55 }
  0xcc   : > { %653 = vmatpush1.bf16.msra.mxu1 %v964_v57 }
  0xce   : > { %v503_v58 = vld [vmem:[#allocation2 + $0x68] sm:$0x33]  ;;  %v504_v59 = vld [vmem:[#allocation2 + $0x70] sm:$0x33] }
  0xcf   : > { %v905_v60 = vcombine.high %v503_v58, %v503_v58  ;;  %v907_v61 = vcombine.high %v504_v59, %v504_v59  ;;  %v904_v62 = vcombine.low %v503_v58, %v503_v58  ;;  %v906_v63 = vcombine.low %v504_v59, %v504_v59 }
  0xd0   : > { %v986_v59 = vmov 0.0  }
  0xd1   : > { %910 = vmatprep.subr.msk.bf16.mxu1 %vm590_vm9, %v905_v60  ;;  %912 = vmatprep.subr.msk.bf16.mxu0 %vm590_vm9, %v907_v61  ;;  %v598_v0 = vsel %vm590_vm9, %v904_v62, 0  ;;  %v604_v1 = vsel %vm590_vm9, %v906_v63, 0  ;;  %v915_v60 = vsel %vm1193_vm5, 1.0, %v986_v59  ;;  %v914_v62 = vsel %vm793_vm7, 1.0, %v986_v59 }
  0xd2   : > { %655 = vmatpush1.bf16.msra.mxu1 %v598_v0  ;;  %696 = vmatpush1.bf16.msra.mxu0 %v604_v1 }
  0xd3   : > { %v509_v26 = vpop.permute.xlu0 %508 }
  0xd5   : > { %911 = vmatmul.mubr.msk.bf16.vlgmr.msra.gmra.mrb[0].mxu1 %vm586_vm10, %v1135_v17  ;;  %913 = vmatmul.mubr.msk.bf16.vlgmr.msra.gmra.mrb[4].mxu0 %vm586_vm10, %v1135_v17  ;;  %v773_v17 = vshrl.u32 %v1167_v13, 4 }
  0xd7   : > { %v774_v20 = vmul.u32 18, %v773_v17 }
  0xd9   : > { %v775_v23 = vsub.s32 %v741_v8, %v774_v20 }
  0xdb   : > { %vm780_vm13 = vcmp.ne.s32.totalorder %v775_v23, 0  ;;  %vm783_vm14 = vcmp.lt.s32.totalorder %v775_v23, 0  ;;  %v789_v28 = vadd.s32 18, %v775_v23 }
  0xdc   : > { %vm1179_vm2 = vmand %vm783_vm14, %vm780_vm13 }
  0xdd   : > { %v792_v42 = vsel %vm1179_vm2, %v789_v28, %v775_v23 }
  0xde   : > { %vm795_vm6 = vcmp.lt.s32.totalorder %v792_v42, 16 }
  0xdf   : > { %vm798_vm8 = vmand %vm744_vm4, %vm795_vm6 }
  0xe0   : > { %v916_v1 = vsel %vm798_vm8, 1.0, %v986_v59 }
 0x188   : > { %v643_v4 = vpop.f32.mrb[0].mxu0 }
 0x189   : > { %v645_v5 = vpop.f32.mrb[1].mxu0  ;;  %v644_v36 = vadd.f32 %v643_v4, %v509_v26 }
 0x18a   : > { %v647_v7 = vpop.f32.mrb[2].mxu0  ;;  %v646_v32 = vadd.f32 %v645_v5, %v509_v26 }
 0x18b   : > { %v648_v9 = vpop.f32.mrb[3].mxu0  ;;  %v732_v53 = vmax.f32 %v644_v36, 0.0 }
 0x18c   : > { %v733_v49 = vmax.f32 %v646_v32, 0.0 }
 0x1a8   : > { %v684_v34 = vpop.f32.mrb[0].mxu1  ;;  %v725_v35 = vpop.f32.mrb[4].mxu0 }
 0x1a9   : > { %v685_v37 = vadd.f32 %v684_v34, %v509_v26  ;;  %v726_v38 = vadd.f32 %v725_v35, %v509_v26  ;;  %v686_v39 = vpop.f32.mrb[1].mxu1  ;;  %v727_v40 = vpop.f32.mrb[5].mxu0 }
 0x1aa   : > { %v687_v43 = vadd.f32 %v686_v39, %v509_v26  ;;  %v728_v44 = vadd.f32 %v727_v40, %v509_v26  ;;  %v688_v45 = vpop.f32.mrb[2].mxu1  ;;  %v729_v46 = vpop.f32.mrb[6].mxu0 }
 0x1ab   : > { %v734_v48 = vmax.f32 %v685_v37, 0.0  ;;  %v736_v50 = vmax.f32 %v726_v38, 0.0  ;;  %v689_v51 = vpop.f32.mrb[3].mxu1  ;;  %v730_v52 = vpop.f32.mrb[7].mxu0 }
 0x1ac   : > { %v735_v54 = vmax.f32 %v687_v43, 0.0  ;;  %v737_v55 = vmax.f32 %v728_v44, 0.0 }
 0x1ad   : > { %v806_v56 = vsub.f32 %v736_v50, %v733_v49 }
 0x1ae   : > { %v805_v57 = vsub.f32 %v735_v54, %v732_v53  ;;  %v807_v58 = vsub.f32 %v737_v55, %v734_v48 }
 0x1af   : > { %v809_v61 = vand.u32 2147483647, %v806_v56 }
 0x1b0   : > { %v808_v63 = vand.u32 2147483647, %v805_v57  ;;  %v810_v0 = vand.u32 2147483647, %v807_v58 }
 0x1b1   : > { %v812_v2 = vmul.f32 %v915_v60, %v809_v61 }
 0x1b2   : > { %v811_v3 = vmul.f32 %v914_v62, %v808_v63  ;;  %v813_v4 = vmul.f32 %v916_v1, %v810_v0 }
 0x1b4   : > { %v814_v5 = vadd.f32 %v812_v2, %v811_v3 }
 0x1b6   : > { %v815_v6 = vadd.f32 %v814_v5, %v813_v4 }
 0x1b8   : > { %816 = vadd.xlane.f32.xlu1 %v815_v6 }
 0x245   : > { %v817_v7 = vpop.xlane.xlu1 %816 }
 0x246   : > { %v818_v9 = vrot.slane %v817_v7, 4 }
 0x248   : > { %v819_v8 = vadd.f32 %v818_v9, %v817_v7 }
 0x24a   : > { %v820_v10 = vrot.slane %v819_v8, 2 }
 0x24c   : > { %v821_v11 = vadd.f32 %v820_v10, %v819_v8 }
 0x24e   : > { %v822_v12 = vrot.slane %v821_v11, 1 }
 0x250   : > { %v823_v13 = vadd.f32 %v822_v12, %v821_v11 }
 0x252   : > { %v824_v14 = vmul.f32 4.8828126e-05, %v823_v13 }
 0x254   : > { %825 = vst [vmem:[%s166_s5] sm:$0x1] %v824_v14 }
 0x255 PF: > { %s13_s12 = sadd.s32 1, %s975_s12  }
 0x256   : > { %p10_p4 = scmp.ge.s32.totalorder %s13_s12, 4  }
 0x258   :  { %12 = sbr.rel (!%p10_p4) target bundleno = 1 (0x1), region = 62 }

</bundles_post_ra>
